<compile_context>
chip_gen: v5e
topology: v5e:2x2
jax: 0.10.0
libtpu: 0.0.40
codegen_flags: <defaults>
</compile_context>

<pallas_src>
import jax
import jax.numpy as jnp
from jax.experimental import pallas as pl
from jax.experimental.pallas import tpu as pltpu


def se_gate_conv1x1_kernel(x_ref, g_ref, w_ref, o_ref):
    # x_ref: (C, tm)   g_ref: (1, C)   w_ref: (O, C)   o_ref: (O, tm)
    # Fold the gate into the weight: (O, C) * sigmoid((1, C)) is ~4 vregs of work,
    # essentially free compared to scaling the (C, tm) activation tile every step.
    gate = jax.nn.sigmoid(g_ref[...].astype(jnp.float32))                  # EUP
    w_scaled = (w_ref[...].astype(jnp.float32) * gate).astype(x_ref.dtype)  # (O, C)
    # MXU matmul: K = C = 144, output lanes = tm. Operands widen to f32 natively.
    o_ref[...] = jnp.dot(
        w_scaled, x_ref[...], preferred_element_type=jnp.float32
    ).astype(o_ref.dtype)


def _tensorcores_per_chip():
    """Best-effort detection; only v7x has 2 TensorCores per chip."""
    try:
        info = pltpu.get_tpu_info()
        ver = str(getattr(info, "chip_version", "")).lower()
        if ver:
            return 2 if ("7x" in ver or "v7" in ver) else 1
    except Exception:
        pass
    try:
        kind = jax.devices()[0].device_kind.lower()
        if "v7" in kind or "7x" in kind:
            return 2
    except Exception:
        pass
    return 1


def sigmoid_mul_conv2d(x48, x52, weight, *, tm_target=4096):
    """x48: (N, C, H, W), x52: (N, C, 1, 1), weight: (O, C, 1, 1) -> (N, O, H, W)."""
    N, C, H, W = x48.shape
    O = weight.shape[0]
    M = H * W
    LANE = 128

    # Pure reshapes only (channel-major order preserved) — no pad, no transpose.
    x = x48.reshape(N, C, M)      # (N, C, M)
    g = x52.reshape(N, 1, C)      # (N, 1, C): lane-dense gate row
    w = weight.reshape(O, C)      # (O, C)

    # ----- Spatial tiling ----------------------------------------------------
    m_aligned = pl.cdiv(M, LANE) * LANE
    tm_cap = max(LANE, (tm_target // LANE) * LANE)
    # Force >=2 spatial tiles only when there are 2 TensorCores (v7x) and no other
    # parallel grid work (N == 1); on v5e/v6e the grid is a serial loop.
    want_split = _tensorcores_per_chip() >= 2 and N == 1 and m_aligned >= 2 * LANE

    if m_aligned <= tm_cap and not want_split:
        # One full-extent tile: block dim == array dim, so no 128-alignment needed,
        # no padding copies, no ragged edge at all.
        tm = M
        num_tiles = 1
    else:
        if m_aligned <= tm_cap:
            # v7x: split roughly in half, lane-aligned.
            tm = pl.cdiv(m_aligned // 2, LANE) * LANE
        else:
            tm = tm_cap
        # Last tile may be ragged: Pallas masks its output stores; garbage in the
        # over-read x columns only affects discarded output columns.
        num_tiles = pl.cdiv(M, tm)

    itemsize = jnp.dtype(x48.dtype).itemsize
    cost = pl.CostEstimate(
        flops=2 * N * M * C * O,
        transcendentals=N * C,
        bytes_accessed=(N * C * M + N * C + O * C + N * O * M) * itemsize,
    )

    out = pl.pallas_call(
        se_gate_conv1x1_kernel,
        out_shape=jax.ShapeDtypeStruct((N, O, M), x48.dtype),
        grid_spec=pltpu.PrefetchScalarGridSpec(
            num_scalar_prefetch=0,
            grid=(N, num_tiles),
            in_specs=[
                pl.BlockSpec((None, C, tm), lambda n, i: (n, 0, i)),  # x spatial tile
                pl.BlockSpec((None, 1, C), lambda n, i: (n, 0, 0)),   # per-batch gate row
                pl.BlockSpec((O, C), lambda n, i: (0, 0)),            # resident weight
            ],
            out_specs=pl.BlockSpec((None, O, tm), lambda n, i: (n, 0, i)),
        ),
        compiler_params=pltpu.CompilerParams(
            dimension_semantics=("parallel", "parallel"),
        ),
        cost_estimate=cost,
    )(x, g, w)

    return out.reshape(N, O, H, W)


if __name__ == "__main__":
    key = jax.random.PRNGKey(0)
    k1, k2, k3 = jax.random.split(key, 3)

    # Small shapes consistent with the module: channels fixed at 144 -> 24,
    # spatial reduced from 56x56 to 16x16, batch 1.
    N, C, O, H, W = 1, 144, 24, 16, 16
    x48 = jax.random.normal(k1, (N, C, H, W), dtype=jnp.float32)
    x52 = jax.random.normal(k2, (N, C, 1, 1), dtype=jnp.float32)
    weight = jax.random.normal(k3, (O, C, 1, 1), dtype=jnp.float32) * (1.0 / jnp.sqrt(C))

    out = sigmoid_mul_conv2d(x48, x52, weight)
    out = jax.block_until_ready(out)

    # Pure-JAX reference for sanity.
    gated = x48 * jax.nn.sigmoid(x52)                             # (N, C, H, W)
    ref = jnp.einsum("nchw,oc->nohw", gated, weight.reshape(O, C))
    assert out.shape == (N, O, H, W)
    assert jnp.allclose(out, ref, atol=1e-4, rtol=1e-4)

    print("KERNEL_OK")
</pallas_src>

<mosaic_0001>
module attributes {stable_mosaic.version = 11 : i64} {
  func.func @se_gate_conv1x1_kernel(%arg0: i32, %arg1: i32, %arg2: memref<1x144x256xf32, #tpu.memory_space<vmem>>, %arg3: memref<1x1x144xf32, #tpu.memory_space<vmem>>, %arg4: memref<24x144xf32, #tpu.memory_space<vmem>>, %arg5: memref<1x24x256xf32, #tpu.memory_space<vmem>>) attributes {dimension_semantics = [#tpu.dimension_semantics<parallel>, #tpu.dimension_semantics<parallel>], iteration_bounds = array<i64: 1, 1>, scalar_prefetch = 0 : i64, scratch_operands = 0 : i64, tpu.core_type = #tpu.core_type<tc>, window_params = [{transform_indices = @transform_0, window_bounds = array<i64: 1, 144, 256>}, {transform_indices = @transform_1, window_bounds = array<i64: 1, 1, 144>}, {pipeline_mode = #tpu.pipeline_mode<synchronous>, transform_indices = @transform_2, window_bounds = array<i64: 24, 144>}, {transform_indices = @transform_3, window_bounds = array<i64: 1, 24, 256>}]} {
    %c0 = arith.constant 0 : index
    %c0_0 = arith.constant 0 : index
    %c0_1 = arith.constant 0 : index
    %0 = vector.load %arg3[%c0, %c0_0, %c0_1] : memref<1x1x144xf32, #tpu.memory_space<vmem>>, vector<1x1x144xf32>
    %1 = vector.shape_cast %0 : vector<1x1x144xf32> to vector<1x144xf32>
    %2 = arith.negf %1 : vector<1x144xf32>
    %3 = math.exp %2 : vector<1x144xf32>
    %cst = arith.constant 1.000000e+00 : f32
    %4 = vector.broadcast %cst : f32 to vector<1x144xf32>
    %5 = arith.addf %4, %3 : vector<1x144xf32>
    %6 = arith.divf %4, %5 : vector<1x144xf32>
    %c0_2 = arith.constant 0 : index
    %c0_3 = arith.constant 0 : index
    %7 = vector.load %arg4[%c0_2, %c0_3] : memref<24x144xf32, #tpu.memory_space<vmem>>, vector<24x144xf32>
    %8 = vector.broadcast %6 : vector<1x144xf32> to vector<24x144xf32>
    %9 = arith.mulf %7, %8 : vector<24x144xf32>
    %c0_4 = arith.constant 0 : index
    %c0_5 = arith.constant 0 : index
    %c0_6 = arith.constant 0 : index
    %10 = vector.load %arg2[%c0_4, %c0_5, %c0_6] : memref<1x144x256xf32, #tpu.memory_space<vmem>>, vector<1x144x256xf32>
    %11 = vector.shape_cast %10 : vector<1x144x256xf32> to vector<144x256xf32>
    %cst_7 = arith.constant dense<0.000000e+00> : vector<24x256xf32>
    %12 = tpu.matmul %9, %11, %cst_7 {dimension_numbers = #tpu.dot_dimension_numbers<[1], [0], [0], [1], [0, 0, 1, 1], [], []>} : vector<24x144xf32>, vector<144x256xf32>, vector<24x256xf32> -> vector<24x256xf32>
    %c0_8 = arith.constant 0 : index
    %c0_9 = arith.constant 0 : index
    %c0_10 = arith.constant 0 : index
    %13 = vector.load %arg5[%c0_8, %c0_9, %c0_10] : memref<1x24x256xf32, #tpu.memory_space<vmem>>, vector<1x24x256xf32>
    %14 = vector.shape_cast %13 : vector<1x24x256xf32> to vector<24x256xf32>
    %15 = vector.shape_cast %12 : vector<24x256xf32> to vector<1x24x256xf32>
    tpu.vector_store %arg5[%c0_8, %c0_9, %c0_10], %15 {strides = array<i32>} : memref<1x24x256xf32, #tpu.memory_space<vmem>>, vector<1x24x256xf32>,
    return
  }
  func.func @transform_0(%arg0: i32, %arg1: i32) -> (i32, i32, i32) {
    %c0_i32 = arith.constant 0 : i32
    %c0_i32_0 = arith.constant 0 : i32
    return %arg0, %c0_i32, %arg1 : i32, i32, i32
  }
  func.func @transform_1(%arg0: i32, %arg1: i32) -> (i32, i32, i32) {
    %c0_i32 = arith.constant 0 : i32
    %c0_i32_0 = arith.constant 0 : i32
    %c0_i32_1 = arith.constant 0 : i32
    return %arg0, %c0_i32, %c0_i32_0 : i32, i32, i32
  }
  func.func @transform_2(%arg0: i32, %arg1: i32) -> (i32, i32) {
    %c0_i32 = arith.constant 0 : i32
    %c0_i32_0 = arith.constant 0 : i32
    %c0_i32_1 = arith.constant 0 : i32
    return %c0_i32, %c0_i32_0 : i32, i32
  }
  func.func @transform_3(%arg0: i32, %arg1: i32) -> (i32, i32, i32) {
    %c0_i32 = arith.constant 0 : i32
    %c0_i32_0 = arith.constant 0 : i32
    return %arg0, %c0_i32, %arg1 : i32, i32, i32
  }
}

</mosaic_0001>

<bundles_post_ra>
// kernel: tpu_custom_call.1
= control target key start
LH: loop header
LB: loop body
LE: loop exit
PB: predicated region body
PF: predicated region fallthrough
CT: control target
= control target key end

     0   :  { %8 = vsyncpa [#allocation3], 0  ;;  %s445_s0 = inlined_call_operand.hbm [shape: f32[1,144,256], index: 0, kind: input, shape index: {}]   ;;  %s446_s1 = inlined_call_operand.hbm [shape: f32[1,1,144], index: 1, kind: input, shape index: {}]   ;;  %s447_s2 = inlined_call_operand.hbm [shape: f32[24,144], index: 2, kind: input, shape index: {}]   ;;  %s448_s3 = inlined_call_operand.hbm [shape: f32[1,24,256], index: 3, kind: output, shape index: {}]  }
   0x1   :  { %9 = vsyncpa [#allocation6], 0  ;;  %s29_s14 = sshll.u32 %s446_s1, 4  ;;  %s30_s14 = int_to_ptr.hbm [resolvable:$true] %s29_s14 }
   0x2   :  { %10 = vsyncpa [#allocation4], 0  ;;  %s392_s15 = smov [#allocation5]   ;;  %s15_s19 = sshll.u32 %s445_s0, 4  ;;  %s16_s19 = int_to_ptr.hbm [resolvable:$true] %s15_s19 }
   0x3   :  { %s31_s16 = sshll.u32 %s392_s15, 4  ;;  %s393_s20 = smov [#allocation2]   ;;  %s32_s16 = int_to_ptr.vmem [resolvable:$true] %s31_s16 }
   0x4   :  { %34 = dma.hbm_to_vmem [thread:$0]  %s30_s14, 32, %s32_s16, [#allocation6]  }
   0x5   :  { %s17_s21 = sshll.u32 %s393_s20, 4  ;;  %s394_s22 = smov 256   ;;  %s18_s21 = int_to_ptr.vmem [resolvable:$true] %s17_s21 }
   0x6   :  { %s395_s23 = smov 16   ;;  %s39_s25 = sshll.u32 %s447_s2, 4  ;;  %s40_s25 = int_to_ptr.hbm [resolvable:$true] %s39_s25 }
   0x7   :  { %23 = dma.hbm_to_vmem [thread:$0]  %s16_s19, 4608, %s18_s21, [#allocation3], %s394_s22, %s394_s22, %s395_s23  }
   0x8   :  { %s396_s26 = smov [#allocation7]  }
   0x9   :  { %s41_s27 = sshll.u32 %s396_s26, 4  ;;  %s42_s27 = int_to_ptr.vmem [resolvable:$true] %s41_s27 }
   0xa   :  { %47 = dma.hbm_to_vmem [thread:$0]  %s40_s25, 768, %s42_s27, [#allocation6], %s394_s22, %s394_s22, %s395_s23  }
   0xb   :  { %386 = dma.done.wait [#allocation3], 4608  }
   0xc   :  { %387 = vsyncadd [#allocation3], 4294962688 }
   0xd   :  { %388 = dma.done.wait [#allocation6], 800  }
   0xe   :  { %389 = vsyncadd [#allocation6], 4294966496  ;;  %v128_v0 = vld [vmem:[#allocation2 + $0xf8] sm:$0xff]  ;;  %v126_v1 = vld [vmem:[#allocation2 + $0xe8] sm:$0xff]  ;;  %vm133_vm4 = vcmask 130048   ;;  %s397_s0 = smov [#allocation8]  }
   0xf   :  { %195 = vmatpush.msra.mxu2 %v128_v0  ;;  %v127_v2 = vld [vmem:[#allocation2 + $0xf0] sm:$0xff]  ;;  %v125_v3 = vld [vmem:[#allocation2 + $0xe0] sm:$0xff]  ;;  %v124_v4 = vld [vmem:[#allocation2 + $0xd8] sm:$0xff]  ;;  %s257_s2 = sshll.u32 %s397_s0, 4  ;;  %s259_s30 = sshll.u32 %s448_s3, 4  ;;  %s258_s2 = int_to_ptr.vmem [resolvable:$true] %s257_s2  ;;  %s260_s30 = int_to_ptr.hbm [resolvable:$true] %s259_s30 }
  0x10   :  { %143 = vmatpush.msra.mxu0 %v127_v2  ;;  %v123_v5 = vld [vmem:[#allocation2 + $0xd0] sm:$0xff]  ;;  %v122_v6 = vld [vmem:[#allocation2 + $0xc8] sm:$0xff]  ;;  %v121_v7 = vld [vmem:[#allocation2 + $0xc0] sm:$0xff] }
  0x11   :  { %196 = vmatpush.msra.mxu2 %v126_v1  ;;  %v120_v8 = vld [vmem:[#allocation2 + $0xb8] sm:$0xff]  ;;  %v119_v9 = vld [vmem:[#allocation2 + $0xb0] sm:$0xff]  ;;  %v118_v10 = vld [vmem:[#allocation2 + $0xa8] sm:$0xff] }
  0x12   :  { %144 = vmatpush.msra.mxu0 %v125_v3  ;;  %v117_v11 = vld [vmem:[#allocation2 + $0xa0] sm:$0xff]  ;;  %v132_v12 = vld [vmem:[#allocation2 + $0x118] sm:$0xff]  ;;  %v130_v14 = vld [vmem:[#allocation2 + $0x108] sm:$0xff] }
  0x13   :  { %197 = vmatpush.msra.mxu2 %v124_v4  ;;  %v116_v13 = vld [vmem:[#allocation2 + $0x98] sm:$0xff]  ;;  %235 = vmatpush.msra.mxu3 %v132_v12  ;;  %v60_v15 = vld [vmem:[#allocation5] sm:$0x3]  ;;  %v115_v16 = vld [vmem:[#allocation2 + $0x90] sm:$0xff] }
  0x14   :  { %145 = vmatpush.msra.mxu0 %v123_v5  ;;  %v273_v17 = vmul.f32 -1.442695, %v60_v15  ;;  %v114_v18 = vld [vmem:[#allocation2 + $0x88] sm:$0xff]  ;;  %v131_v19 = vld [vmem:[#allocation2 + $0x110] sm:$0xff]  ;;  %v129_v20 = vld [vmem:[#allocation2 + $0x100] sm:$0xff] }
  0x15   :  { %198 = vmatpush.msra.mxu2 %v122_v6  ;;  %236 = vmatpush.msra.mxu3 %v130_v14  ;;  %v113_v21 = vld [vmem:[#allocation2 + $0x80] sm:$0xff]  ;;  %v112_v22 = vld [vmem:[#allocation2 + $0x78] sm:$0xff]  ;;  %v111_v23 = vld [vmem:[#allocation2 + $0x70] sm:$0xff] }
  0x16   :  { %146 = vmatpush.msra.mxu0 %v121_v7  ;;  %286 = vpow2.f32 %v273_v17  ;;  %183 = vmatpush.msra.mxu1 %v131_v19  ;;  %v110_v24 = vld [vmem:[#allocation2 + $0x68] sm:$0xff]  ;;  %v109_v25 = vld [vmem:[#allocation2 + $0x60] sm:$0xff]  ;;  %v108_v26 = vld [vmem:[#allocation2 + $0x58] sm:$0xff] }
  0x17   :  { %199 = vmatpush.msra.mxu2 %v120_v8  ;;  %v107_v28 = vld [vmem:[#allocation2 + $0x50] sm:$0xff]  ;;  %v106_v29 = vld [vmem:[#allocation2 + $0x48] sm:$0xff]  ;;  %v105_v31 = vld [vmem:[#allocation2 + $0x40] sm:$0xff] }
  0x18   :  { %147 = vmatpush.msra.mxu0 %v119_v9  ;;  %184 = vmatpush.msra.mxu1 %v129_v20  ;;  %v104_v32 = vld [vmem:[#allocation2 + $0x38] sm:$0xff]  ;;  %v103_v33 = vld [vmem:[#allocation2 + $0x30] sm:$0xff]  ;;  %v102_v34 = vld [vmem:[#allocation2 + $0x28] sm:$0xff] }
  0x19   :  { %200 = vmatpush.msra.mxu2 %v118_v10  ;;  %v101_v35 = vld [vmem:[#allocation2 + $0x20] sm:$0xff]  ;;  %v100_v36 = vld [vmem:[#allocation2 + $0x18] sm:$0xff]  ;;  %v99_v37 = vld [vmem:[#allocation2 + $0x10] sm:$0xff] }
  0x1a   :  { %148 = vmatpush.msra.mxu0 %v117_v11  ;;  %v98_v39 = vld [vmem:[#allocation2 + $0x8] sm:$0xff]  ;;  %v97_v41 = vld [vmem:[#allocation2] sm:$0xff]  ;;  %v82_v56 = vld [vmem:[#allocation7 + $0x10] sm:$0xff] }
  0x1b   :  { %201 = vmatpush.msra.mxu2 %v116_v13  ;;  %v80_v50 = vld [vmem:[#allocation7] sm:$0xff]  ;;  %v81_v51 = vld [vmem:[#allocation7 + $0x8] sm:$0xff]  ;;  %v83_v57 = vld [vmem:[#allocation7 + $0x18] sm:$0xff] }
  0x1c   :  { %149 = vmatpush.msra.mxu0 %v115_v16  ;;  %v287_v27 = vpop.eup %286  ;;  %v84_v60 = vld [vmem:[#allocation7 + $0x20] sm:$0xff]  ;;  %v85_v61 = vld [vmem:[#allocation7 + $0x28] sm:$0xff] }
  0x1d   :  { %202 = vmatpush.msra.mxu2 %v114_v18  ;;  %v64_v30 = vadd.f32 1.0, %v287_v27 }
  0x1e   :  { %150 = vmatpush.msra.mxu0 %v113_v21 }
  0x1f   :  { %203 = vmatpush.msra.mxu2 %v112_v22  ;;  %288 = vrcp.f32 %v64_v30  ;;  %v76_v42 = vand.u32 2147483648, %v64_v30  ;;  %vm70_vm0 = vweird.f32 %v64_v30  ;;  %v74_v44 = vand.u32 2147483647, %v64_v30 }
  0x20   :  { %151 = vmatpush.msra.mxu0 %v111_v23 }
  0x21   :  { %204 = vmatpush.msra.mxu2 %v110_v24  ;;  %v77_v46 = vor.u32 1.1754944e-38, %v76_v42  ;;  %vm75_vm3 = vcmp.eq.f32.partialorder %v74_v44, 8.507059e+37 }
  0x22   :  { %152 = vmatpush.msra.mxu0 %v109_v25 }
  0x23   :  { %205 = vmatpush.msra.mxu2 %v108_v26 }
  0x24   :  { %153 = vmatpush.msra.mxu0 %v107_v28 }
  0x25   :  { %206 = vmatpush.msra.mxu2 %v106_v29  ;;  %v289_v38 = vpop.eup %288 }
  0x26   :  { %154 = vmatpush.msra.mxu0 %v105_v31  ;;  %v66_v40 = vmul.f32 %v289_v38, %v64_v30  ;;  %vm71_vm1 = vweird.f32 %v289_v38 }
  0x27   :  { %207 = vmatpush.msra.mxu2 %v104_v32  ;;  %vm72_vm2 = vmor %vm70_vm0, %vm71_vm1 }
  0x28   :  { %155 = vmatpush.msra.mxu0 %v103_v33  ;;  %v67_v43 = vsub.f32 1.0, %v66_v40 }
  0x29   :  { %208 = vmatpush.msra.mxu2 %v102_v34 }
  0x2a   :  { %156 = vmatpush.msra.mxu0 %v101_v35  ;;  %v68_v45 = vmul.f32 %v289_v38, %v67_v43 }
  0x2b   :  { %209 = vmatpush.msra.mxu2 %v100_v36 }
  0x2c   :  { %157 = vmatpush.msra.mxu0 %v99_v37  ;;  %v69_v47 = vadd.f32 %v289_v38, %v68_v45 }
  0x2d   :  { %210 = vmatpush.msra.mxu2 %v98_v39 }
  0x2e   :  { %158 = vmatpush.msra.mxu0 %v97_v41  ;;  %v73_v48 = vsel %vm72_vm2, %v289_v38, %v69_v47 }
  0x2f   :  { %v78_v49 = vsel %vm75_vm3, %v77_v46, %v73_v48 }
  0x30   :  { %v87_v52 = vperm.slane %v78_v49, 0  ;;  %v88_v53 = vperm.slane %v78_v49, 1 }
  0x32   :  { %v91_v54 = vmul.f32 %v87_v52, %v80_v50  ;;  %v92_v55 = vmul.f32 %v88_v53, %v81_v51  ;;  %v93_v58 = vmul.f32 %v87_v52, %v82_v56  ;;  %v94_v59 = vmul.f32 %v88_v53, %v83_v57 }
  0x33   :  { %v95_v62 = vmul.f32 %v87_v52, %v84_v60  ;;  %v96_v63 = vmul.f32 %v88_v53, %v85_v61 }
  0x34   :  { %211 = vmatmul.f32.vlgmr.msra.gmra.mxu2 %v91_v54  ;;  %277 = vmatmul.msk.f32.vlgmr.msra.gmra.mxu3 %vm133_vm4, %v92_v55 }
  0x35   :  { %159 = vmatmul.f32.vlgmr.msra.gmra.mxu0 %v91_v54  ;;  %274 = vmatmul.msk.f32.vlgmr.msra.gmra.mxu1 %vm133_vm4, %v92_v55 }
  0x3c   :  { %214 = vmatmul.f32.gmra.mxu2 %v93_v58  ;;  %278 = vmatmul.msk.f32.gmra.mxu3 %vm133_vm4, %v94_v59 }
  0x3d   :  { %162 = vmatmul.f32.gmra.mxu0 %v93_v58  ;;  %275 = vmatmul.msk.f32.gmra.mxu1 %vm133_vm4, %v94_v59 }
  0x44   :  { %217 = vmatmul.f32.gmra.mxu2 %v95_v62  ;;  %279 = vmatmul.msk.f32.gmra.mxu3 %vm133_vm4, %v96_v63 }
  0x45   :  { %165 = vmatmul.f32.gmra.mxu0 %v95_v62  ;;  %276 = vmatmul.msk.f32.gmra.mxu1 %vm133_vm4, %v96_v63 }
  0xb2   :  { %v160_v0 = vpop.f32.mrf.mxu0  ;;  %v186_v1 = vpop.f32.mrf.mxu1 }
  0xb3   :  { %v187_v2 = vadd.f32 %v186_v1, %v160_v0 }
  0xb5   :  { %247 = vst [vmem:[#allocation8] sm:$0xff] %v187_v2 }
  0xb7   :  { %v212_v3 = vpop.f32.mrf.mxu2  ;;  %v238_v4 = vpop.f32.mrf.mxu3 }
  0xb8   :  { %v239_v5 = vadd.f32 %v238_v4, %v212_v3 }
  0xba   :  { %248 = vst [vmem:[#allocation8 + $0x8] sm:$0xff] %v239_v5  ;;  %v163_v6 = vpop.f32.mrf.mxu0  ;;  %v189_v7 = vpop.f32.mrf.mxu1 }
  0xbb   :  { %v190_v8 = vadd.f32 %v189_v7, %v163_v6 }
  0xbd   :  { %249 = vst [vmem:[#allocation8 + $0x10] sm:$0xff] %v190_v8 }
  0xbf   :  { %v215_v9 = vpop.f32.mrf.mxu2  ;;  %v241_v10 = vpop.f32.mrf.mxu3 }
  0xc0   :  { %v242_v11 = vadd.f32 %v241_v10, %v215_v9 }
  0xc2   :  { %250 = vst [vmem:[#allocation8 + $0x18] sm:$0xff] %v242_v11  ;;  %v166_v12 = vpop.f32.mrf.mxu0  ;;  %v192_v13 = vpop.f32.mrf.mxu1 }
  0xc3   :  { %v193_v14 = vadd.f32 %v192_v13, %v166_v12 }
  0xc5   :  { %251 = vst [vmem:[#allocation8 + $0x20] sm:$0xff] %v193_v14 }
  0xc7   :  { %v218_v15 = vpop.f32.mrf.mxu2  ;;  %v244_v16 = vpop.f32.mrf.mxu3 }
  0xc8   :  { %v245_v17 = vadd.f32 %v244_v16, %v218_v15 }
  0xca   :  { %252 = vst [vmem:[#allocation8 + $0x28] sm:$0xff] %v245_v17 }
  0xcb   :  { %265 = dma.vmem_to_hbm [thread:$0]  %s258_s2, 768, %s260_s30, [#allocation4], %s394_s22, %s394_s22, %s395_s23  }
  0xcc   :  { %390 = dma.done.wait [#allocation4], 768  }
  0xcd   :  { %391 = vsyncadd [#allocation4], 4294966528 }
  0xce   :  { %270 = vsyncpa [#allocation3], 1 }
  0xcf   :  { %271 = vsyncpa [#allocation6], 1 }
  0xd0   :  { %272 = vsyncpa [#allocation4], 1 }

</bundles_post_ra>
